<compile_context>
chip_gen: v7x
topology: tpu7x:2x2x1
jax: 0.10.0
libtpu: 0.0.40
codegen_flags: <defaults>
</compile_context>

<pallas_src>
import functools

import jax
import jax.numpy as jnp
from jax.experimental import pallas as pl
from jax.experimental.pallas import tpu as pltpu

_EPS = 1e-6  # torch.nn.PairwiseDistance default eps


def _make_contrastive_kernel(margin):
    margin = float(margin)

    def contrastive_kernel(x0_ref, x1_ref, gt_ref, out_ref):
        x0 = x0_ref[...].astype(jnp.float32)          # (TB, D)
        x1 = x1_ref[...].astype(jnp.float32)          # (TB, D)
        gt = gt_ref[...].astype(jnp.float32)          # (TB, 1)

        # PairwiseDistance(p=2): D = sqrt(sum((x0 - x1 + eps)^2, axis=-1))
        diff = x0 - x1 + _EPS
        d_sq = jnp.sum(diff * diff, axis=-1, keepdims=True)   # == D^2 directly (no sqrt needed)
        dist = jnp.sqrt(d_sq)                                  # D, needed for the hinge term

        hinge = jnp.maximum(margin - dist, 0.0)
        out_ref[...] = 0.5 * (gt * d_sq + (1.0 - gt) * hinge * hinge)

    return contrastive_kernel


def _pick_block_b(B, D, itemsize, target_tile_bytes=2 * 1024 * 1024, max_rows=2048):
    """Batch-tile size: multiple of 8, ~target_tile_bytes per (TB, D) input tile."""
    rows = max(8, target_tile_bytes // max(1, D * itemsize))
    rows = min(rows, max_rows)
    rows = min(rows, ((B + 7) // 8) * 8)   # don't exceed (8-rounded) batch
    return max(8, (rows // 8) * 8)


@functools.partial(jax.jit, static_argnames=("margin", "block_b"))
def contrastive_loss(out0, out1, label, margin=0.5, block_b=None):
    """Per-sample contrastive loss. out0/out1: (B, D); label: (B,). Returns (B,) f32."""
    B, D = out0.shape
    itemsize = jnp.dtype(out0.dtype).itemsize
    tb = block_b if block_b is not None else _pick_block_b(B, D, itemsize)

    label2d = label.reshape(B, 1)  # dtype cast happens inside the kernel

    # TODO(synk): for production D < 128, pack rows so the lane axis is >=128
    # (segmented per-row reduction) to avoid wasting 1 - D/128 of every vreg/DMA.
    # For D >= 128 this is a no-op.

    out = pl.pallas_call(
        _make_contrastive_kernel(margin),
        out_shape=jax.ShapeDtypeStruct((B, 1), jnp.float32),
        grid=(pl.cdiv(B, tb),),
        in_specs=[
            pl.BlockSpec((tb, D), lambda i: (i, 0)),
            pl.BlockSpec((tb, D), lambda i: (i, 0)),
            pl.BlockSpec((tb, 1), lambda i: (i, 0)),
        ],
        out_specs=pl.BlockSpec((tb, 1), lambda i: (i, 0)),
        compiler_params=pltpu.CompilerParams(
            dimension_semantics=("parallel",),   # megacore sharding on v7x
        ),
    )(out0, out1, label2d)

    # torch: .squeeze() on the per-sample distances -> (B,) loss.
    return out.reshape(B)


if __name__ == "__main__":
    key = jax.random.PRNGKey(0)
    k0, k1, k2 = jax.random.split(key, 3)

    B, D = 8, 32
    margin = 0.5
    out0 = jax.random.normal(k0, (B, D), dtype=jnp.float32)
    out1 = jax.random.normal(k1, (B, D), dtype=jnp.float32)
    label = (jax.random.uniform(k2, (B,)) > 0.5).astype(jnp.float32)

    loss = contrastive_loss(out0, out1, label, margin=margin)
    jax.block_until_ready(loss)

    # Pure-JAX reference (same math as torch PairwiseDistance + contrastive loss).
    d = jnp.sqrt(jnp.sum((out0 - out1 + _EPS) ** 2, axis=-1))
    ref = label * 0.5 * d**2 + (1.0 - label) * 0.5 * jnp.maximum(margin - d, 0.0) ** 2

    assert loss.shape == (B,)
    assert jnp.allclose(loss, ref, atol=1e-5, rtol=1e-5)

    print("KERNEL_OK")
</pallas_src>

<mosaic_0001>
module attributes {stable_mosaic.version = 11 : i64} {
  func.func @contrastive_kernel(%arg0: i32, %arg1: memref<8x32xf32, #tpu.memory_space<vmem>>, %arg2: memref<8x32xf32, #tpu.memory_space<vmem>>, %arg3: memref<8x1xf32, #tpu.memory_space<vmem>>, %arg4: memref<8x1xf32, #tpu.memory_space<vmem>>) attributes {dimension_semantics = [#tpu.dimension_semantics<parallel>], iteration_bounds = array<i64: 1>, scalar_prefetch = 0 : i64, scratch_operands = 0 : i64, tpu.core_type = #tpu.core_type<tc>, window_params = [{transform_indices = @transform_0, window_bounds = array<i64: 8, 32>}, {transform_indices = @transform_1, window_bounds = array<i64: 8, 32>}, {transform_indices = @transform_2, window_bounds = array<i64: 8, 1>}, {transform_indices = @transform_3, window_bounds = array<i64: 8, 1>}]} {
    %c0 = arith.constant 0 : index
    %c0_0 = arith.constant 0 : index
    %0 = vector.load %arg1[%c0, %c0_0] : memref<8x32xf32, #tpu.memory_space<vmem>>, vector<8x32xf32>
    %c0_1 = arith.constant 0 : index
    %c0_2 = arith.constant 0 : index
    %1 = vector.load %arg2[%c0_1, %c0_2] : memref<8x32xf32, #tpu.memory_space<vmem>>, vector<8x32xf32>
    %c0_3 = arith.constant 0 : index
    %c0_4 = arith.constant 0 : index
    %2 = vector.load %arg3[%c0_3, %c0_4] : memref<8x1xf32, #tpu.memory_space<vmem>>, vector<8x1xf32>
    %3 = arith.subf %0, %1 : vector<8x32xf32>
    %cst = arith.constant 9.99999997E-7 : f32
    %4 = vector.broadcast %cst : f32 to vector<8x32xf32>
    %5 = arith.addf %3, %4 : vector<8x32xf32>
    %6 = arith.mulf %5, %5 : vector<8x32xf32>
    %cst_5 = arith.constant dense<0.000000e+00> : vector<8xf32>
    %7 = vector.multi_reduction <add>, %6, %cst_5 [1] : vector<8x32xf32> to vector<8xf32>
    %8 = vector.shape_cast %7 : vector<8xf32> to vector<8x1xf32>
    %9 = math.sqrt %8 : vector<8x1xf32>
    %cst_6 = arith.constant 5.000000e-01 : f32
    %10 = vector.broadcast %cst_6 : f32 to vector<8x1xf32>
    %11 = arith.subf %10, %9 : vector<8x1xf32>
    %cst_7 = arith.constant 0.000000e+00 : f32
    %12 = vector.broadcast %cst_7 : f32 to vector<8x1xf32>
    %13 = arith.maximumf %11, %12 : vector<8x1xf32>
    %14 = arith.mulf %2, %8 : vector<8x1xf32>
    %cst_8 = arith.constant 1.000000e+00 : f32
    %15 = vector.broadcast %cst_8 : f32 to vector<8x1xf32>
    %16 = arith.subf %15, %2 : vector<8x1xf32>
    %17 = arith.mulf %16, %13 : vector<8x1xf32>
    %18 = arith.mulf %17, %13 : vector<8x1xf32>
    %19 = arith.addf %14, %18 : vector<8x1xf32>
    %cst_9 = arith.constant 5.000000e-01 : f32
    %20 = vector.broadcast %cst_9 : f32 to vector<8x1xf32>
    %21 = arith.mulf %20, %19 : vector<8x1xf32>
    %c0_10 = arith.constant 0 : index
    %c0_11 = arith.constant 0 : index
    %22 = vector.load %arg4[%c0_10, %c0_11] : memref<8x1xf32, #tpu.memory_space<vmem>>, vector<8x1xf32>
    tpu.vector_store %arg4[%c0_10, %c0_11], %21 {strides = array<i32>} : memref<8x1xf32, #tpu.memory_space<vmem>>, vector<8x1xf32>,
    return
  }
  func.func @transform_0(%arg0: i32) -> (i32, i32) {
    %c0_i32 = arith.constant 0 : i32
    %c0_i32_0 = arith.constant 0 : i32
    return %arg0, %c0_i32 : i32, i32
  }
  func.func @transform_1(%arg0: i32) -> (i32, i32) {
    %c0_i32 = arith.constant 0 : i32
    %c0_i32_0 = arith.constant 0 : i32
    return %arg0, %c0_i32 : i32, i32
  }
  func.func @transform_2(%arg0: i32) -> (i32, i32) {
    %c0_i32 = arith.constant 0 : i32
    %c0_i32_0 = arith.constant 0 : i32
    return %arg0, %c0_i32 : i32, i32
  }
  func.func @transform_3(%arg0: i32) -> (i32, i32) {
    %c0_i32 = arith.constant 0 : i32
    %c0_i32_0 = arith.constant 0 : i32
    return %arg0, %c0_i32 : i32, i32
  }
}

</mosaic_0001>

<bundles_post_ra>
// kernel: contrastive_loss.1
= control target key start
LH: loop header
LB: loop body
LE: loop exit
PB: predicated region body
PF: predicated region fallthrough
CT: control target
= control target key end

     0   :  { %vm20_vm0 = vcmask 261120   ;;  %vm39_vm3 = vcmask 7168   ;;  %s79_s0 = inlined_call_operand.vmem [shape: f32[8,32], index: 0, kind: input, shape index: {}]   ;;  %s80_s1 = inlined_call_operand.vmem [shape: f32[8,32], index: 1, kind: input, shape index: {}]   ;;  %s81_s2 = inlined_call_operand.vmem [shape: f32[8,1], index: 2, kind: input, shape index: {}]   ;;  %s82_s3 = inlined_call_operand.vmem [shape: f32[8,1], index: 3, kind: output, shape index: {}]  }
   0x1   :  { %v14_v0 = vld [vmem:[%s79_s0] sm:$0xff] }
   0x2   :  { %v15_v1 = vld [vmem:[%s80_s1] sm:$0xff] }
   0x3   :  { %v17_v2 = vsub.f32 %v14_v0, %v15_v1  ;;  %v16_v11 = vld [vmem:[%s81_s2] sm:$0xff] }
   0x4   :  { %v34_v14 = vsub.f32 1.0, %v16_v11 }
   0x5   :  { %v18_v3 = vadd.f32 1e-06, %v17_v2 }
   0x7   :  { %v19_v4 = vmul.f32 %v18_v3, %v18_v3 }
   0x9   :  { %v21_v5 = vsel %vm20_vm0, %v19_v4, 0.0 }
   0xa   :  { %22 = vadd.xlane.f32.xlu0 %v21_v5 }
  0x97   :  { %v23_v6 = vpop.xlane.xlu0 %22 }
  0x98   :  { %45 = vrsqrt.f32 %v23_v6  ;;  %vm26_vm1 = vcmp.eq.f32.partialorder %v23_v6, inf  ;;  %v29_v9 = vand.u32 2147483648, %v23_v6  ;;  %vm28_vm2 = vcmp.eq.f32.partialorder %v23_v6, 0.0 }
  0x99   :  { %v33_v17 = vmul.f32 %v23_v6, %v16_v11 }
  0xa2   :  { %v46_v7 = vpop.eup %45 }
  0xa3   :  { %v25_v8 = vmul.f32 %v46_v7, %v23_v6 }
  0xa5   :  { %v27_v10 = vsel %vm26_vm1, %v23_v6, %v25_v8 }
  0xa6   :  { %v30_v12 = vsel %vm28_vm2, %v29_v9, %v27_v10 }
  0xa7   :  { %v31_v13 = vsub.f32 0.5, %v30_v12 }
  0xa9   :  { %v32_v15 = vmax.f32 %v31_v13, 0.0 }
  0xab   :  { %v35_v16 = vmul.f32 %v34_v14, %v32_v15 }
  0xad   :  { %v36_v18 = vmul.f32 %v35_v16, %v32_v15 }
  0xaf   :  { %v37_v19 = vadd.f32 %v36_v18, %v33_v17 }
  0xb1   :  { %v38_v20 = vmul.f32 0.5, %v37_v19 }
  0xb3   :  { %40 = vst.msk [vmem:[%s82_s3] sm:$0xff] %vm39_vm3, %v38_v20 }

</bundles_post_ra>
